<compile_context>
chip_gen: v5e
topology: v5e:2x2
jax: 0.10.0
libtpu: 0.0.40
codegen_flags: <defaults>
</compile_context>

<pallas_src>
import math

import jax
import jax.numpy as jnp
from jax.experimental import pallas as pl
from jax.experimental.pallas import tpu as pltpu

NEG_SLOPE = 0.01  # nn.LeakyReLU default negative_slope


def _leaky_relu(x):
    return jnp.where(x >= 0, x, NEG_SLOPE * x)


def _round_up(x, m):
    return (x + m - 1) // m * m


def _kgat_kernel(ids_ref, cnt_ref,                 # scalar prefetch (SMEM)
                 adj_ref, esrc_ref, edst_ref,      # pipelined inputs (VMEM)
                 w1_ref, b1_ref, w2_ref, b2_ref,
                 o_ref,                            # output tile (VMEM)
                 nh_acc):                          # f32 accumulator scratch
    i = pl.program_id(0)
    k = pl.program_id(1)

    @pl.when(k == 0)
    def _():
        nh_acc[...] = jnp.zeros_like(nh_acc)

    # Message passing: accumulate this non-zero source block (skip padded slots).
    @pl.when(k < cnt_ref[i])
    def _():
        nh_acc[...] += jnp.dot(adj_ref[...], esrc_ref[...],
                               preferred_element_type=jnp.float32)

    # Bi-interaction epilogue: once per destination tile.
    @pl.when(k == pl.num_programs(1) - 1)
    def _():
        node = edst_ref[...].astype(jnp.float32)
        nh = nh_acc[...]
        h1 = jnp.dot(node + nh, w1_ref[...],
                     preferred_element_type=jnp.float32) + b1_ref[...]
        h2 = jnp.dot(node * nh, w2_ref[...],
                     preferred_element_type=jnp.float32) + b2_ref[...]
        # TODO(synk): training-mode message_dropout (pltpu.prng_*) — eval mode is identity.
        o_ref[...] = (_leaky_relu(h1) + _leaky_relu(h2)).astype(o_ref.dtype)


def kgat_aggregator(adj_att, entity_embed, w1, b1, w2, b2, *,
                    tm=256, tk=512, max_src_blocks=None):
    """KGAT bi-interaction aggregator (eval mode).

    adj_att:      (N, N) dense adjacency with per-edge attention, [dst, src].
    entity_embed: (N, D_in) node embeddings.
    w1, w2:       (D_out, D_in) — PyTorch nn.Linear weight layout.
    b1, b2:       (D_out,)
    max_src_blocks: optional static bound on non-zero source blocks per dst
                    tile (needed if this wrapper is called under jit).
    """
    N, D_in = entity_embed.shape
    D_out = w1.shape[0]

    # ---- tile & padding choices --------------------------------------------
    N_pad = _round_up(N, 128)
    tm_e = min(_round_up(tm, 8), N_pad)
    if N_pad // tm_e < 2 and tm_e > 128:          # keep >=2 dst tiles (megacore)
        tm_e = max(128, _round_up(N_pad // 2, 8))
    tk_e = min(_round_up(tk, 128), N_pad)
    N_pad = _round_up(N_pad, math.lcm(tm_e, tk_e))
    n_i, n_k = N_pad // tm_e, N_pad // tk_e
    D_out_pad = _round_up(D_out, 128)             # lane-dense output stores

    f32 = jnp.float32
    adj_p = jnp.zeros((N_pad, N_pad), f32).at[:N, :N].set(adj_att.astype(f32))
    emb_p = jnp.zeros((N_pad, D_in), f32).at[:N, :].set(entity_embed.astype(f32))
    w1_p = jnp.zeros((D_in, D_out_pad), f32).at[:, :D_out].set(w1.T.astype(f32))
    w2_p = jnp.zeros((D_in, D_out_pad), f32).at[:, :D_out].set(w2.T.astype(f32))
    b1_p = jnp.zeros((1, D_out_pad), f32).at[0, :D_out].set(b1.astype(f32))
    b2_p = jnp.zeros((1, D_out_pad), f32).at[0, :D_out].set(b2.astype(f32))

    # bf16 copies for the HBM-dominant message-passing stream (f32 accumulation).
    adj_bf = adj_p.astype(jnp.bfloat16)
    emb_bf = emb_p.astype(jnp.bfloat16)

    # ---- block-sparse schedule (scalar prefetch) ---------------------------
    blk_nz = jnp.abs(adj_p).reshape(n_i, tm_e, n_k, tk_e).sum(axis=(1, 3)) > 0
    counts = blk_nz.sum(axis=1).astype(jnp.int32)                     # (n_i,)
    # Non-zero block ids first (stable argsort of 0/1 keys).
    order = jnp.argsort(jnp.where(blk_nz, 0, 1).astype(jnp.int32),
                        axis=1).astype(jnp.int32)
    if max_src_blocks is None:
        k_max = max(int(counts.max()), 1)
    else:
        k_max = max(min(int(max_src_blocks), n_k), 1)
    ids = order[:, :k_max]
    # Padded slots repeat the last valid block id -> no extra DMA; compute skipped.
    last_valid = order[jnp.arange(n_i), jnp.maximum(counts - 1, 0)]
    pad_mask = jnp.arange(k_max)[None, :] >= counts[:, None]
    ids = jnp.where(pad_mask, last_valid[:, None], ids).astype(jnp.int32)

    out = pl.pallas_call(
        _kgat_kernel,
        out_shape=jax.ShapeDtypeStruct((N_pad, D_out_pad), entity_embed.dtype),
        grid_spec=pltpu.PrefetchScalarGridSpec(
            num_scalar_prefetch=2,                 # ids, counts -> SMEM
            grid=(n_i, k_max),
            in_specs=[
                # adjacency tile: (dst tile i, non-zero source block ids[i, k])
                pl.BlockSpec((tm_e, tk_e),
                             lambda i, k, ids_r, cnt_r: (i, ids_r[i, k])),
                # source-side embeddings (bf16)
                pl.BlockSpec((tk_e, D_in),
                             lambda i, k, ids_r, cnt_r: (ids_r[i, k], 0)),
                # dst-tile embeddings (f32), only used by the epilogue
                pl.BlockSpec((tm_e, D_in),
                             lambda i, k, ids_r, cnt_r: (i, 0)),
                pl.BlockSpec((D_in, D_out_pad),
                             lambda i, k, ids_r, cnt_r: (0, 0)),   # W1^T
                pl.BlockSpec((1, D_out_pad),
                             lambda i, k, ids_r, cnt_r: (0, 0)),   # b1
                pl.BlockSpec((D_in, D_out_pad),
                             lambda i, k, ids_r, cnt_r: (0, 0)),   # W2^T
                pl.BlockSpec((1, D_out_pad),
                             lambda i, k, ids_r, cnt_r: (0, 0)),   # b2
            ],
            out_specs=pl.BlockSpec((tm_e, D_out_pad),
                                   lambda i, k, ids_r, cnt_r: (i, 0)),
            scratch_shapes=[pltpu.VMEM((tm_e, D_in), jnp.float32)],
        ),
        compiler_params=pltpu.CompilerParams(
            dimension_semantics=("parallel", "arbitrary"),
            vmem_limit_bytes=32 * 1024 * 1024),
    )(ids, counts, adj_bf, emb_bf, emb_p, w1_p, b1_p, w2_p, b2_p)

    return out[:N, :D_out]


if __name__ == "__main__":
    # Small, deterministic synthetic problem.
    N, D_in, D_out = 512, 64, 64
    key = jax.random.PRNGKey(0)
    k_emb, k_edge, k_att, k_w1, k_b1, k_w2, k_b2 = jax.random.split(key, 7)

    entity_embed = jax.random.normal(k_emb, (N, D_in), dtype=jnp.float32)

    # Banded sparse graph with per-edge attention, stored densely: adj[dst, src].
    dst = jnp.arange(N)[:, None]
    src = jnp.arange(N)[None, :]
    band = jnp.abs(dst - src) <= 100
    edge_mask = band & (jax.random.uniform(k_edge, (N, N)) < 0.3)
    att = jax.random.uniform(k_att, (N, N), dtype=jnp.float32)
    adj_att = jnp.where(edge_mask, att, 0.0)

    # Deterministic "Linear" parameters (PyTorch layout: W is (out, in)).
    bound = 1.0 / jnp.sqrt(jnp.float32(D_in))
    w1 = jax.random.uniform(k_w1, (D_out, D_in), minval=-bound, maxval=bound)
    b1 = jax.random.uniform(k_b1, (D_out,), minval=-bound, maxval=bound)
    w2 = jax.random.uniform(k_w2, (D_out, D_in), minval=-bound, maxval=bound)
    b2 = jax.random.uniform(k_b2, (D_out,), minval=-bound, maxval=bound)

    # tm/tk chosen small here so the demo exercises multiple dst tiles, multiple
    # k blocks, padded schedule slots and zero-block skipping.
    out = kgat_aggregator(adj_att, entity_embed, w1, b1, w2, b2, tm=128, tk=128)
    out = jax.block_until_ready(out)

    # Pure-JAX reference (with the same bf16 rounding of the message-passing
    # operands the kernel uses; accumulation is f32 in both).
    with jax.default_matmul_precision("highest"):
        adj_r = adj_att.astype(jnp.bfloat16).astype(jnp.float32)
        emb_r = entity_embed.astype(jnp.bfloat16).astype(jnp.float32)
        nh_ref = adj_r @ emb_r
        h1_ref = (entity_embed + nh_ref) @ w1.T + b1
        h2_ref = (entity_embed * nh_ref) @ w2.T + b2
        ref = _leaky_relu(h1_ref) + _leaky_relu(h2_ref)

    assert out.shape == (N, D_out)
    assert bool(jnp.allclose(out, ref, atol=2e-2, rtol=2e-2)), "mismatch vs reference"
    print("KERNEL_OK")
</pallas_src>

<mosaic_0001>
module attributes {stable_mosaic.version = 11 : i64} {
  func.func @_kgat_kernel(%arg0: i32, %arg1: i32, %arg2: memref<4x3xi32, #tpu.memory_space<smem>>, %arg3: memref<4xi32, #tpu.memory_space<smem>>, %arg4: memref<128x128xbf16, #tpu.memory_space<vmem>>, %arg5: memref<128x64xbf16, #tpu.memory_space<vmem>>, %arg6: memref<128x64xf32, #tpu.memory_space<vmem>>, %arg7: memref<64x128xf32, #tpu.memory_space<vmem>>, %arg8: memref<1x128xf32, #tpu.memory_space<vmem>>, %arg9: memref<64x128xf32, #tpu.memory_space<vmem>>, %arg10: memref<1x128xf32, #tpu.memory_space<vmem>>, %arg11: memref<128x128xf32, #tpu.memory_space<vmem>>, %arg12: memref<128x64xf32, #tpu.memory_space<vmem>>) attributes {dimension_semantics = [#tpu.dimension_semantics<parallel>, #tpu.dimension_semantics<arbitrary>], iteration_bounds = array<i64: 4, 3>, scalar_prefetch = 2 : i64, scratch_operands = 1 : i64, tpu.core_type = #tpu.core_type<tc>, window_params = [{transform_indices = @transform_0, window_bounds = array<i64: 128, 128>}, {transform_indices = @transform_1, window_bounds = array<i64: 128, 64>}, {transform_indices = @transform_2, window_bounds = array<i64: 128, 64>}, {pipeline_mode = #tpu.pipeline_mode<synchronous>, transform_indices = @transform_3, window_bounds = array<i64: 64, 128>}, {pipeline_mode = #tpu.pipeline_mode<synchronous>, transform_indices = @transform_4, window_bounds = array<i64: 1, 128>}, {pipeline_mode = #tpu.pipeline_mode<synchronous>, transform_indices = @transform_5, window_bounds = array<i64: 64, 128>}, {pipeline_mode = #tpu.pipeline_mode<synchronous>, transform_indices = @transform_6, window_bounds = array<i64: 1, 128>}, {transform_indices = @transform_7, window_bounds = array<i64: 128, 128>}]} {
    %c0_i32 = arith.constant 0 : i32
    %0 = arith.cmpi eq, %arg1, %c0_i32 : i32
    %1 = arith.extui %0 : i1 to i32
    %c0_i32_0 = arith.constant 0 : i32
    %2 = arith.cmpi ne, %1, %c0_i32_0 : i32
    scf.if %2 {
      %cst = arith.constant 0.000000e+00 : f32
      %11 = vector.broadcast %cst : f32 to vector<128x64xf32>
      %c0 = arith.constant 0 : index
      %c0_3 = arith.constant 0 : index
      %12 = vector.load %arg12[%c0, %c0_3] : memref<128x64xf32, #tpu.memory_space<vmem>>, vector<128x64xf32>
      tpu.vector_store %arg12[%c0, %c0_3], %11 {strides = array<i32>} : memref<128x64xf32, #tpu.memory_space<vmem>>, vector<128x64xf32>,
    } else {
    }
    %3 = arith.index_cast %arg0 : i32 to index
    %4 = memref.load %arg3[%3] : memref<4xi32, #tpu.memory_space<smem>>
    %5 = arith.cmpi slt, %arg1, %4 : i32
    %6 = arith.extui %5 : i1 to i32
    %c0_i32_1 = arith.constant 0 : i32
    %7 = arith.cmpi ne, %6, %c0_i32_1 : i32
    scf.if %7 {
      %c0 = arith.constant 0 : index
      %c0_3 = arith.constant 0 : index
      %11 = vector.load %arg12[%c0, %c0_3] : memref<128x64xf32, #tpu.memory_space<vmem>>, vector<128x64xf32>
      %c0_4 = arith.constant 0 : index
      %c0_5 = arith.constant 0 : index
      %12 = vector.load %arg4[%c0_4, %c0_5] : memref<128x128xbf16, #tpu.memory_space<vmem>>, vector<128x128xbf16>
      %c0_6 = arith.constant 0 : index
      %c0_7 = arith.constant 0 : index
      %13 = vector.load %arg5[%c0_6, %c0_7] : memref<128x64xbf16, #tpu.memory_space<vmem>>, vector<128x64xbf16>
      %cst = arith.constant dense<0.000000e+00> : vector<128x64xf32>
      %14 = tpu.matmul %12, %13, %cst {dimension_numbers = #tpu.dot_dimension_numbers<[1], [0], [0], [1], [0, 0, 1, 1], [], []>} : vector<128x128xbf16>, vector<128x64xbf16>, vector<128x64xf32> -> vector<128x64xf32>
      %15 = arith.addf %11, %14 : vector<128x64xf32>
      %c0_8 = arith.constant 0 : index
      %c0_9 = arith.constant 0 : index
      %16 = vector.load %arg12[%c0_8, %c0_9] : memref<128x64xf32, #tpu.memory_space<vmem>>, vector<128x64xf32>
      tpu.vector_store %arg12[%c0_8, %c0_9], %15 {strides = array<i32>} : memref<128x64xf32, #tpu.memory_space<vmem>>, vector<128x64xf32>,
    } else {
    }
    %c2_i32 = arith.constant 2 : i32
    %8 = arith.cmpi eq, %arg1, %c2_i32 : i32
    %9 = arith.extui %8 : i1 to i32
    %c0_i32_2 = arith.constant 0 : i32
    %10 = arith.cmpi ne, %9, %c0_i32_2 : i32
    scf.if %10 {
      %c0 = arith.constant 0 : index
      %c0_3 = arith.constant 0 : index
      %11 = vector.load %arg6[%c0, %c0_3] : memref<128x64xf32, #tpu.memory_space<vmem>>, vector<128x64xf32>
      %c0_4 = arith.constant 0 : index
      %c0_5 = arith.constant 0 : index
      %12 = vector.load %arg12[%c0_4, %c0_5] : memref<128x64xf32, #tpu.memory_space<vmem>>, vector<128x64xf32>
      %13 = arith.addf %11, %12 : vector<128x64xf32>
      %c0_6 = arith.constant 0 : index
      %c0_7 = arith.constant 0 : index
      %14 = vector.load %arg7[%c0_6, %c0_7] : memref<64x128xf32, #tpu.memory_space<vmem>>, vector<64x128xf32>
      %cst = arith.constant dense<0.000000e+00> : vector<128x128xf32>
      %15 = tpu.matmul %13, %14, %cst {dimension_numbers = #tpu.dot_dimension_numbers<[1], [0], [0], [1], [0, 0, 1, 1], [], []>} : vector<128x64xf32>, vector<64x128xf32>, vector<128x128xf32> -> vector<128x128xf32>
      %c0_8 = arith.constant 0 : index
      %c0_9 = arith.constant 0 : index
      %16 = vector.load %arg8[%c0_8, %c0_9] : memref<1x128xf32, #tpu.memory_space<vmem>>, vector<1x128xf32>
      %17 = vector.broadcast %16 : vector<1x128xf32> to vector<128x128xf32>
      %18 = arith.addf %15, %17 : vector<128x128xf32>
      %19 = arith.mulf %11, %12 : vector<128x64xf32>
      %c0_10 = arith.constant 0 : index
      %c0_11 = arith.constant 0 : index
      %20 = vector.load %arg9[%c0_10, %c0_11] : memref<64x128xf32, #tpu.memory_space<vmem>>, vector<64x128xf32>
      %cst_12 = arith.constant dense<0.000000e+00> : vector<128x128xf32>
      %21 = tpu.matmul %19, %20, %cst_12 {dimension_numbers = #tpu.dot_dimension_numbers<[1], [0], [0], [1], [0, 0, 1, 1], [], []>} : vector<128x64xf32>, vector<64x128xf32>, vector<128x128xf32> -> vector<128x128xf32>
      %c0_13 = arith.constant 0 : index
      %c0_14 = arith.constant 0 : index
      %22 = vector.load %arg10[%c0_13, %c0_14] : memref<1x128xf32, #tpu.memory_space<vmem>>, vector<1x128xf32>
      %23 = vector.broadcast %22 : vector<1x128xf32> to vector<128x128xf32>
      %24 = arith.addf %21, %23 : vector<128x128xf32>
      %cst_15 = arith.constant 0.000000e+00 : f32
      %25 = vector.broadcast %cst_15 : f32 to vector<128x128xf32>
      %26 = arith.cmpf oge, %18, %25 : vector<128x128xf32>
      %cst_16 = arith.constant 0.00999999977 : f32
      %27 = vector.broadcast %cst_16 : f32 to vector<128x128xf32>
      %28 = arith.mulf %27, %18 : vector<128x128xf32>
      %29 = arith.select %26, %18, %28 : vector<128x128xi1>, vector<128x128xf32>
      %cst_17 = arith.constant 0.000000e+00 : f32
      %30 = vector.broadcast %cst_17 : f32 to vector<128x128xf32>
      %31 = arith.cmpf oge, %24, %30 : vector<128x128xf32>
      %cst_18 = arith.constant 0.00999999977 : f32
      %32 = vector.broadcast %cst_18 : f32 to vector<128x128xf32>
      %33 = arith.mulf %32, %24 : vector<128x128xf32>
      %34 = arith.select %31, %24, %33 : vector<128x128xi1>, vector<128x128xf32>
      %35 = arith.addf %29, %34 : vector<128x128xf32>
      %c0_19 = arith.constant 0 : index
      %c0_20 = arith.constant 0 : index
      %36 = vector.load %arg11[%c0_19, %c0_20] : memref<128x128xf32, #tpu.memory_space<vmem>>, vector<128x128xf32>
      tpu.vector_store %arg11[%c0_19, %c0_20], %35 {strides = array<i32>} : memref<128x128xf32, #tpu.memory_space<vmem>>, vector<128x128xf32>,
    } else {
    }
    return
  }
  func.func @transform_0(%arg0: i32, %arg1: i32, %arg2: memref<4x3xi32, #tpu.memory_space<smem>>, %arg3: memref<4xi32, #tpu.memory_space<smem>>) -> (i32, i32) {
    %0 = arith.index_cast %arg0 : i32 to index
    %1 = arith.index_cast %arg1 : i32 to index
    %2 = memref.load %arg2[%0, %1] : memref<4x3xi32, #tpu.memory_space<smem>>
    %c0_i32 = arith.constant 0 : i32
    return %arg0, %2 : i32, i32
  }
  func.func @transform_1(%arg0: i32, %arg1: i32, %arg2: memref<4x3xi32, #tpu.memory_space<smem>>, %arg3: memref<4xi32, #tpu.memory_space<smem>>) -> (i32, i32) {
    %0 = arith.index_cast %arg0 : i32 to index
    %1 = arith.index_cast %arg1 : i32 to index
    %2 = memref.load %arg2[%0, %1] : memref<4x3xi32, #tpu.memory_space<smem>>
    %c0_i32 = arith.constant 0 : i32
    %c0_i32_0 = arith.constant 0 : i32
    return %2, %c0_i32 : i32, i32
  }
  func.func @transform_2(%arg0: i32, %arg1: i32, %arg2: memref<4x3xi32, #tpu.memory_space<smem>>, %arg3: memref<4xi32, #tpu.memory_space<smem>>) -> (i32, i32) {
    %c0_i32 = arith.constant 0 : i32
    %c0_i32_0 = arith.constant 0 : i32
    return %arg0, %c0_i32 : i32, i32
  }
  func.func @transform_3(%arg0: i32, %arg1: i32, %arg2: memref<4x3xi32, #tpu.memory_space<smem>>, %arg3: memref<4xi32, #tpu.memory_space<smem>>) -> (i32, i32) {
    %c0_i32 = arith.constant 0 : i32
    %c0_i32_0 = arith.constant 0 : i32
    %c0_i32_1 = arith.constant 0 : i32
    return %c0_i32, %c0_i32_0 : i32, i32
  }
  func.func @transform_4(%arg0: i32, %arg1: i32, %arg2: memref<4x3xi32, #tpu.memory_space<smem>>, %arg3: memref<4xi32, #tpu.memory_space<smem>>) -> (i32, i32) {
    %c0_i32 = arith.constant 0 : i32
    %c0_i32_0 = arith.constant 0 : i32
    %c0_i32_1 = arith.constant 0 : i32
    return %c0_i32, %c0_i32_0 : i32, i32
  }
  func.func @transform_5(%arg0: i32, %arg1: i32, %arg2: memref<4x3xi32, #tpu.memory_space<smem>>, %arg3: memref<4xi32, #tpu.memory_space<smem>>) -> (i32, i32) {
    %c0_i32 = arith.constant 0 : i32
    %c0_i32_0 = arith.constant 0 : i32
    %c0_i32_1 = arith.constant 0 : i32
    return %c0_i32, %c0_i32_0 : i32, i32
  }
  func.func @transform_6(%arg0: i32, %arg1: i32, %arg2: memref<4x3xi32, #tpu.memory_space<smem>>, %arg3: memref<4xi32, #tpu.memory_space<smem>>) -> (i32, i32) {
    %c0_i32 = arith.constant 0 : i32
    %c0_i32_0 = arith.constant 0 : i32
    %c0_i32_1 = arith.constant 0 : i32
    return %c0_i32, %c0_i32_0 : i32, i32
  }
  func.func @transform_7(%arg0: i32, %arg1: i32, %arg2: memref<4x3xi32, #tpu.memory_space<smem>>, %arg3: memref<4xi32, #tpu.memory_space<smem>>) -> (i32, i32) {
    %c0_i32 = arith.constant 0 : i32
    %c0_i32_0 = arith.constant 0 : i32
    return %arg0, %c0_i32 : i32, i32
  }
}

</mosaic_0001>

<bundles_post_ra>
// kernel: tpu_custom_call.1
= control target key start
LH: loop header
LB: loop body
LE: loop exit
PB: predicated region body
PF: predicated region fallthrough
CT: control target
= control target key end

     0   :  { %s1768_s15 = smov [#allocation4]   ;;  %s1769_s16 = smov [#allocation5]   ;;  %s2263_s0 = inlined_call_operand.vmem [shape: s32[4,3], index: 0, kind: input, shape index: {}]   ;;  %s2264_s2 = inlined_call_operand.hbm [shape: bf16[512,512], index: 2, kind: input, shape index: {}]   ;;  %s2265_s3 = inlined_call_operand.vmem [shape: bf16[512,64], index: 3, kind: input, shape index: {}]   ;;  %s2266_s4 = inlined_call_operand.vmem [shape: f32[512,64], index: 4, kind: input, shape index: {}]   ;;  %s2267_s5 = inlined_call_operand.vmem [shape: f32[64,128], index: 5, kind: input, shape index: {}]   ;;  %s2268_s6 = inlined_call_operand.vmem [shape: f32[1,128], index: 6, kind: input, shape index: {}]   ;;  %s2269_s7 = inlined_call_operand.vmem [shape: f32[64,128], index: 7, kind: input, shape index: {}]   ;;  %s2270_s8 = inlined_call_operand.vmem [shape: f32[1,128], index: 8, kind: input, shape index: {}]   ;;  %s2271_s9 = inlined_call_operand.hbm [shape: f32[512,128], index: 9, kind: output, shape index: {}]   ;;  %s2272_s1 = inlined_call_operand.vmem [shape: s32[4], index: 1, kind: input, shape index: {}]  }
   0x1   :  { %2282 = sst [smem:[#allocation25_spill]] %s2271_s9  ;;  %s15_s11 = sshll.u32 %s2263_s0, 4  ;;  %s16_s11 = int_to_ptr.vmem [resolvable:$true] %s15_s11 }
   0x2   :  { %s20_s14 = sshll.u32 %s2272_s1, 4  ;;  %s21_s14 = int_to_ptr.vmem [resolvable:$true] %s20_s14 }
   0x3   :  { %18 = dma.vmem_to_smem %s16_s11, 64, %s1768_s15, [#allocation3] }
   0x4   :  { %23 = dma.vmem_to_smem %s21_s14, 16, %s1769_s16, [#allocation3] }
   0x5   :  { %1714 = dma.done.wait [#allocation3], 80 }
   0x6   :  { %1715 = vsyncadd [#allocation3], 4294967216 }
   0x7   :  { %26 = sfence }
   0x8   :  { %27 = vsyncpa [#allocation7], 0 }
   0x9   :  { %29 = vsyncpa [#allocation7 + $0x1], 0 }
   0xa   :  { %30 = vsyncpa [#allocation8], 0 }
   0xb   :  { %32 = vsyncpa [#allocation8 + $0x1], 0  ;;  %s1832_s17 = smov 0   ;;  %s1834_s0 = smov 0  }
   0xc   :  { %s1836_s18 = smov 0   ;;  %s1838_s1 = smov 0  }
   0xd   :  { %s1840_s19 = smov 0   ;;  %s1842_s20 = smov 0  }
   0xe   :  { %s1844_s21 = smov 0   ;;  %s1846_s22 = smov 0  }
   0xf   :  { %s1848_s23 = smov 0   ;;  %s1850_s24 = smov 0  }
  0x10   :  { %s1852_s25 = smov 0  }
  0x11 LB: > { %2283 = sst [smem:[#allocation15_spill]] %s1726_s17  ;;  %s47_s27 = sadd.s32 1, %s1758_s23  ;;  %s1766_s25 = sphi %s1852_s25, %s38_s25   ;;  %s1762_s24 = sphi %s1850_s24, %s2310_s24   ;;  %s1758_s23 = sphi %s1848_s23, %s2309_s23   ;;  %s1754_s22 = sphi %s1846_s22, %s2308_s22   ;;  %s1750_s21 = sphi %s1844_s21, %s2307_s21   ;;  %s1746_s20 = sphi %s1842_s20, %s2306_s20   ;;  %s1742_s19 = sphi %s1840_s19, %s2314_s19   ;;  %s1738_s1 = sphi %s1838_s1, %s2313_s1   ;;  %s1734_s18 = sphi %s1836_s18, %s2304_s18   ;;  %s1730_s0 = sphi %s1834_s0, %s2312_s0   ;;  %s1726_s17 = sphi %s1832_s17, %s2311_s17  }
  0x12   : > { %2284 = sst [smem:[#allocation16_spill]] %s1734_s18  ;;  %s50_s28 = sadd.s32 1, %s1762_s24 }
  0x13   : > { %2285 = sst [smem:[#allocation17_spill]] %s1746_s20  ;;  %p48_p0 = scmp.ge.s32.totalorder %s47_s27, 3 }
  0x14   : > { %2286 = sst [smem:[#allocation18_spill]] %s1758_s23  ;;  %s54_s29 = sshra.s32 %s1758_s23, 7 }
  0x15   : > { %2287 = sst [smem:[#allocation19_spill]] %s1762_s24  ;;  %s56_s30 = sadd.s32 %s1762_s24, %s54_s29 }
  0x16   : > { %s59_s10 = sand.u32 127, %s1758_s23  ;;  %s2316_s27 = smov (%p48_p0, %s47_s27), 0 }
  0x17   : > { %2288 = sst [smem:[#allocation20_spill]] %s2316_s27  ;;  %s2318_s28 = smov (!%p48_p0, %s50_s28), %s1762_s24 }
  0x18   : > { %s1290_s11 = sadd.s32 4294967294, %s1766_s25   ;;  %s1291_s12 = sshll.u32 %s56_s30, 7 }
  0x19   : > { %p52_p1 = scmp.ge.s32.totalorder %s2318_s28, 4  ;;  %s1897_s13 = sadd.s32 %s1291_s12, %s59_s10 }
  0x1a   : > { %s61_s14 = sld [smem:[#allocation4 + %s1897_s13]]  ;;  %s62_s15 = sshra.s32 %s2316_s27, 7 }
  0x1b   : > { %s2320_s28 = smov (%p52_p1, %s2318_s28), 0  ;;  %s67_s16 = sand.u32 127, %s2316_s27 }
  0x1c   : > { %2289 = sst [smem:[#allocation21_spill]] %s2320_s28  ;;  %s75_s29 = sadd.s32 1, %s1746_s20 }
  0x1d   : > { %s64_s26 = sadd.s32 %s62_s15, %s2320_s28  ;;  %p82_p2 = scmp.ne.s32.totalorder %s1746_s20, %s1742_s19 }
  0x1e   : > { %s1292_s30 = sshll.u32 %s64_s26, 7  ;;  %s70_s10 = ssub.s32 %s1762_s24, %s2320_s28 }
  0x1f   : > { %s68_s12 = sadd.s32 %s1292_s30, %s67_s16  ;;  %p88_p3 = scmp.ne.s32.totalorder %s1742_s19, %s1738_s1 }
  0x20   : > { %s69_s23 = sld [smem:[#allocation4 + %s68_s12]]  ;;  %p83_p4 = scmp.eq.s32.totalorder %s1766_s25, 0 }
  0x21   : > { %s2290_s9 = sadd.s32 4294967295, %s1766_s25   ;;  %p251_p6 = scmp.eq.s32.totalorder %s70_s10, 0 }
  0x22   : > { %p89_p5 = scmp.eq.s32.totalorder %s2290_s9, 0  ;;  %s253_s27 = sadd.s32 1, %s1734_s18 }
  0x23   : > { %p263_p7 = scmp.ne.s32.totalorder %s1734_s18, %s1730_s0  ;;  %s2292_s26 = smov %s2290_s9 }
  0x24   : > { %p1918_p8 = por %p89_p5, %p88_p3  ;;  %p264_p9 = scmp.eq.s32.totalorder %s2292_s26, 11 }
  0x25   : > { %s1925_s1 = scalar_select %p251_p6, %s1734_s18, %s253_s27  }
  0x26   : > { %p1927_p10 = por %p264_p9, %p263_p7  ;;  %p269_p11 = scmp.ne.s32.totalorder %s1730_s0, %s1726_s17 }
  0x27   : > { %2293 = sst [smem:[#allocation22_spill]] %s1925_s1  ;;  %s71_s9 = ssub.s32 %s61_s14, %s69_s23 }
  0x28   : > { %p270_p12 = scmp.eq.s32.totalorder %s1290_s11, 11  ;;  %s72_s30 = sor.u32 %s71_s9, %s70_s10 }
  0x29   : > { %p73_p13 = scmp.eq.s32.totalorder %s72_s30, 0  ;;  %p84_p1 = por %p83_p4, %p82_p2 }
  0x2a   : > { %p1933_p0 = por %p270_p12, %p269_p11  ;;  %s302_s27 = sand.u32 1, %s1746_s20  }
  0x2b   : > { %s1944_s26 = scalar_select %p73_p13, %s1746_s20, %s75_s29  }
  0x2c   : > { %s2295_s12 = scalar_select %p1933_p0, 1, 0 }
  0x2d   : > { %2297 = sst [smem:[#allocation24_spill]] %s1944_s26  ;;  %p1488_p3 = scmp.lt.s32.totalorder %s1766_s25, 12 }
  0x2e   : > { %2296 = sst [smem:[#allocation23_spill]] %s2295_s12  ;;  %s1297_s28 = sshll.u32 %s302_s27, 6 }
  0x2f   : > { %s1472_s1 = scalar_select %p84_p1, [#allocation4], [#allocation10] }
  0x30   : > { %s2322_s13 = smov (!%p84_p1, %s1897_s13), 0  ;;  %p1948_p5 = pnand %p1488_p3, %p84_p1 }
  0x31   : > { %s2324_s1 = smov (!%p1488_p3, %s1472_s1), [#allocation11]  ;;  %s2326_s13 = smov (!%p1488_p3, %s2322_s13), 0 }
  0x32   : > { %s314_s11 = sld [smem:[%s2324_s1 + %s2326_s13]]  ;;  %s1414_s14 = sshll.u32 %s1762_s24, 6 }
  0x33   : > { %s306_s10 = scalar_lea.vmem [#allocation6], %s1297_s28  ;;  %p1302_p2 = scmp.ge.s32.totalorder %s1766_s25, 1 }
  0x34   : > { %s1953_s9 = sshll.u32 %s306_s10, 4  ;;  %p366_p4 = scmp.lt.s32.totalorder %s1766_s25, 13  ;;  %s325_s9 = int_to_ptr.vmem [resolvable:$true] %s1953_s9 }
  0x35   : > { %s303_s28 = scalar_lea.sflag [#allocation7], %s302_s27  ;;  %p1616_p9 = pneg %p1948_p5 }
  0x36   : > { %p1958_p6 = pnand %p1302_p2, %p366_p4 }
  0x38   : > { %s319_s30 = sadd.s32 %s1414_s14, %s314_s11  ;;  %s1619_s11 = scalar_lea.hbm %s2264_s2, 1024 }
  0x39   : > { %s1301_s26 = sshll.u32 %s319_s30, 2 }
  0x3a   : > { %s321_s12 = scalar_lea.hbm %s2264_s2, %s1301_s26 }
  0x3b   : > { %s322_s13 = sshll.u32 %s321_s12, 4  ;;  %s323_s13 = int_to_ptr.hbm [resolvable:$true] %s322_s13 }
  0x3c   : > { %s1612_s1 = sshra.s32 %s323_s13, 4  ;;  %s1613_s1 = int_to_ptr.hbm [resolvable:$true] %s1612_s1 }
  0x3d   : > { %s1614_s10 = scalar_lea.hbm %s1613_s1, 64  ;;  %p1620_p13 = scmp.lt.s32.totalorder %s1613_s1, %s2264_s2 }
  0x3e   : > { %p1615_p7 = scmp.ne.s32.totalorder %s1613_s1, %s1614_s10  ;;  %p1621_p1 = scmp.lt.s32.totalorder %s1619_s11, %s1614_s10 }
  0x40   : > { %p1617_p11 = pnand %p1616_p9, %p1615_p7  ;;  %p1622_p3 = por %p1621_p1, %p1620_p13 }
  0x42   : > { %p1618_p12 = pneg %p1617_p11 }
  0x44   : > { %p1623_p2 = pnand %p1622_p3, %p1618_p12 }
  0x46   : > { %1626 = shalt.err (!%p1623_p2)
}
  0x47   : > { %s1770_s18 = smov 256   ;;  %s1771_s20 = smov 64  }
  0x48   : > { %s1772_s12 = smov 4   ;;  %370 = sbr.rel (%p1958_p6) target bundleno = 558 (0x22e), region = 48 }
  0x49   : > { %1483 = dma.hbm_to_vmem [thread:$0]  (!%p1948_p5), %s323_s13, 1024, %s325_s9, %s303_s28, %s1770_s18, %s1771_s20, %s1772_s12  }
  0x4a   : > { %s372_s17 = sand.u32 (!%p1958_p6), 1, %s1742_s19  }
  0x4b   : > { %s1303_s24 = sshll.u32 (!%p1958_p6), %s372_s17, 6  ;;  %s373_s27 = scalar_lea.sflag (!%p1958_p6), [#allocation7], %s372_s17 }
  0x4c   : > { %s1978_s26 = scalar_lea.vmem (!%p1958_p6), [#allocation6], %s1303_s24 }
  0x4d   : > { %1717 = dma.done.wait (%p1918_p8), %s373_s27, 1024  }
  0x4e   : > { %1719 = vsyncadd (%p1918_p8), %s373_s27, 4294966272  ;;  %s435_s23 = sshra.s32 %s1750_s21, 7  ;;  %s440_s9 = sand.u32 127, %s1750_s21 }
  0x4f   : > { %s437_s29 = sadd.s32 %s1754_s22, %s435_s23  ;;  %s423_s13 = sand.u32 1, %s1730_s0  }
  0x50   : > { %s1305_s28 = sshll.u32 %s437_s29, 7  ;;  %s1304_s1 = sshll.u32 %s423_s13, 7 }
  0x51   : > { %s441_s10 = sadd.s32 %s1305_s28, %s440_s9  ;;  %s1308_s14 = sshll.u32 %s1754_s22, 4 }
  0x52   : > { %s442_s11 = sld [smem:[#allocation4 + %s441_s10]]  ;;  %p458_p5 = scmp.lt.s32.totalorder %s1308_s14, 63 }
  0x53   : > { %s2001_s9 = scalar_lea.vmem [#allocation9], %s1304_s1  ;;  %p1310_p4 = scmp.ne.s32.totalorder %s1750_s21, 0 }
  0x54   : > { %s2328_s14 = smov (!%p458_p5, %s1308_s14), 63 }
  0x55   : > { %s1309_s15 = sshll.u32 %s2328_s14, 3 }
  0x56   : > { %s1994_s12 = scalar_lea.vmem %s2266_s4, %s1309_s15 }
  0x58   : > { %s1306_s30 = sshll.u32 %s442_s11, 4 }
  0x59   : > { %p444_p8 = scmp.lt.s32.totalorder %s1306_s30, 63  ;;  %467 = sbr.rel (%p1310_p4) target bundleno = 111 (0x6f), region = 56 }
  0x5b   : > { %s2330_s30 = smov (!%p444_p8, %s1306_s30), 63 }
  0x5c   : > { %s1307_s17 = sshll.u32 %s2330_s30, 2 }
  0x5d   : > { %s1999_s23 = scalar_lea.vmem %s2265_s3, %s1307_s17 }
  0x5e   : > { %vm468_vm0 = vcmask 523264   ;;  %v1773_v0 = vmov 0.0  }
  0x5f   : > { %469 = vst.msk [vmem:[#allocation2] sm:$0xff] %vm468_vm0, %v1773_v0 }
  0x60   : > { %470 = vst.msk [vmem:[#allocation2 + $0x8] sm:$0xff] %vm468_vm0, %v1773_v0 }
  0x61   : > { %471 = vst.msk [vmem:[#allocation2 + $0x10] sm:$0xff] %vm468_vm0, %v1773_v0 }
  0x62   : > { %472 = vst.msk [vmem:[#allocation2 + $0x18] sm:$0xff] %vm468_vm0, %v1773_v0 }
  0x63   : > { %473 = vst.msk [vmem:[#allocation2 + $0x20] sm:$0xff] %vm468_vm0, %v1773_v0 }
  0x64   : > { %474 = vst.msk [vmem:[#allocation2 + $0x28] sm:$0xff] %vm468_vm0, %v1773_v0 }
  0x65   : > { %475 = vst.msk [vmem:[#allocation2 + $0x30] sm:$0xff] %vm468_vm0, %v1773_v0 }
  0x66   : > { %476 = vst.msk [vmem:[#allocation2 + $0x38] sm:$0xff] %vm468_vm0, %v1773_v0 }
  0x67   : > { %477 = vst.msk [vmem:[#allocation2 + $0x40] sm:$0xff] %vm468_vm0, %v1773_v0 }
  0x68   : > { %478 = vst.msk [vmem:[#allocation2 + $0x48] sm:$0xff] %vm468_vm0, %v1773_v0 }
  0x69   : > { %479 = vst.msk [vmem:[#allocation2 + $0x50] sm:$0xff] %vm468_vm0, %v1773_v0 }
  0x6a   : > { %480 = vst.msk [vmem:[#allocation2 + $0x58] sm:$0xff] %vm468_vm0, %v1773_v0 }
  0x6b   : > { %481 = vst.msk [vmem:[#allocation2 + $0x60] sm:$0xff] %vm468_vm0, %v1773_v0 }
  0x6c   : > { %482 = vst.msk [vmem:[#allocation2 + $0x68] sm:$0xff] %vm468_vm0, %v1773_v0 }
  0x6d   : > { %483 = vst.msk [vmem:[#allocation2 + $0x70] sm:$0xff] %vm468_vm0, %v1773_v0 }
  0x6e   : > { %484 = vst.msk [vmem:[#allocation2 + $0x78] sm:$0xff] %vm468_vm0, %v1773_v0 }
  0x6f PF: > { %s485_s29 = sld [smem:[#allocation5 + %s1754_s22]] }
  0x75   : > { %p1311_p6 = scmp.ge.s32.totalorder %s1750_s21, %s485_s29 }
  0x77   : > { %489 = sbr.rel (%p1311_p6) target bundleno = 317 (0x13d), region = 60 }
  0x7c   : > { %v1430_v1 = vld [vmem:[%s1999_s23 + $0x38] sm:$0xff]  ;;  %v1429_v2 = vld [vmem:[%s1999_s23 + $0x30] sm:$0xff]  ;;  %v1428_v3 = vld [vmem:[%s1999_s23 + $0x28] sm:$0xff]  ;;  %vm699_vm1 = vcmask 523264  }
  0x7d   : > { %634 = vmatpush.bf16.msra.mxu0 %v1430_v1  ;;  %1432 = vmatpush.bf16.msra.mxu1 %v1430_v1  ;;  %v1427_v4 = vld [vmem:[%s1999_s23 + $0x20] sm:$0xff]  ;;  %v1426_v5 = vld [vmem:[%s1999_s23 + $0x18] sm:$0xff]  ;;  %v1425_v6 = vld [vmem:[%s1999_s23 + $0x10] sm:$0xff] }
  0x7e   : > { %1433 = vmatpush.bf16.msra.mxu2 %v1430_v1  ;;  %1434 = vmatpush.bf16.msra.mxu3 %v1430_v1  ;;  %v1424_v7 = vld [vmem:[%s1999_s23 + $0x8] sm:$0xff]  ;;  %v1423_v8 = vld [vmem:[%s1999_s23] sm:$0xff]  ;;  %v1417_v10 = vld [vmem:[%s1978_s26 + $0x10] sm:$0xff] }
  0x7f   : > { %v1415_v9 = vld [vmem:[%s1978_s26] sm:$0xff]  ;;  %v1421_v12 = vld [vmem:[%s1978_s26 + $0x30] sm:$0xff]  ;;  %v1416_v13 = vld [vmem:[%s1978_s26 + $0x8] sm:$0xff] }
  0x80   : > { %v1419_v11 = vld [vmem:[%s1978_s26 + $0x20] sm:$0xff]  ;;  %v1418_v14 = vld [vmem:[%s1978_s26 + $0x18] sm:$0xff]  ;;  %v1420_v15 = vld [vmem:[%s1978_s26 + $0x28] sm:$0xff] }
  0x81   : > { %635 = vmatpush.bf16.msra.mxu0 %v1429_v2  ;;  %1435 = vmatpush.bf16.msra.mxu1 %v1429_v2  ;;  %v1422_v16 = vld [vmem:[%s1978_s26 + $0x38] sm:$0xff]  ;;  %v490_v17 = vld [vmem:[#allocation2] sm:$0xff]  ;;  %v491_v25 = vld [vmem:[#allocation2 + $0x8] sm:$0xff] }
  0x82   : > { %1436 = vmatpush.bf16.msra.mxu2 %v1429_v2  ;;  %1437 = vmatpush.bf16.msra.mxu3 %v1429_v2  ;;  %v494_v18 = vld [vmem:[#allocation2 + $0x20] sm:$0xff]  ;;  %v495_v26 = vld [vmem:[#allocation2 + $0x28] sm:$0xff]  ;;  %v492_v37 = vld [vmem:[#allocation2 + $0x10] sm:$0xff] }
  0x83   : > { %v498_v23 = vld [vmem:[#allocation2 + $0x40] sm:$0xff]  ;;  %v499_v35 = vld [vmem:[#allocation2 + $0x48] sm:$0xff]  ;;  %v496_v38 = vld [vmem:[#allocation2 + $0x30] sm:$0xff] }
  0x84   : > { %v502_v24 = vld [vmem:[#allocation2 + $0x60] sm:$0xff]  ;;  %v503_v36 = vld [vmem:[#allocation2 + $0x68] sm:$0xff]  ;;  %v500_v47 = vld [vmem:[#allocation2 + $0x50] sm:$0xff] }
  0x85   : > { %636 = vmatpush.bf16.msra.mxu0 %v1428_v3  ;;  %1438 = vmatpush.bf16.msra.mxu1 %v1428_v3  ;;  %v504_v48 = vld [vmem:[#allocation2 + $0x70] sm:$0xff]  ;;  %v493_v49 = vld [vmem:[#allocation2 + $0x18] sm:$0xff] }
  0x86   : > { %1439 = vmatpush.bf16.msra.mxu2 %v1428_v3  ;;  %1440 = vmatpush.bf16.msra.mxu3 %v1428_v3  ;;  %v497_v50 = vld [vmem:[#allocation2 + $0x38] sm:$0xff] }
  0x87   : > { %v501_v59 = vld [vmem:[#allocation2 + $0x58] sm:$0xff] }
  0x88   : > { %v505_v60 = vld [vmem:[#allocation2 + $0x78] sm:$0xff] }
  0x89   : > { %637 = vmatpush.bf16.msra.mxu0 %v1427_v4  ;;  %1441 = vmatpush.bf16.msra.mxu1 %v1427_v4 }
  0x8a   : > { %1442 = vmatpush.bf16.msra.mxu2 %v1427_v4  ;;  %1443 = vmatpush.bf16.msra.mxu3 %v1427_v4 }
  0x8d   : > { %638 = vmatpush.bf16.msra.mxu0 %v1426_v5  ;;  %1444 = vmatpush.bf16.msra.mxu1 %v1426_v5 }
  0x8e   : > { %1445 = vmatpush.bf16.msra.mxu2 %v1426_v5  ;;  %1446 = vmatpush.bf16.msra.mxu3 %v1426_v5 }
  0x91   : > { %639 = vmatpush.bf16.msra.mxu0 %v1425_v6  ;;  %1447 = vmatpush.bf16.msra.mxu1 %v1425_v6 }
  0x92   : > { %1448 = vmatpush.bf16.msra.mxu2 %v1425_v6  ;;  %1449 = vmatpush.bf16.msra.mxu3 %v1425_v6 }
  0x95   : > { %640 = vmatpush.bf16.msra.mxu0 %v1424_v7  ;;  %1450 = vmatpush.bf16.msra.mxu1 %v1424_v7 }
  0x96   : > { %1451 = vmatpush.bf16.msra.mxu2 %v1424_v7  ;;  %1452 = vmatpush.bf16.msra.mxu3 %v1424_v7 }
  0x99   : > { %641 = vmatpush.bf16.msra.mxu0 %v1423_v8  ;;  %1453 = vmatpush.bf16.msra.mxu1 %v1423_v8 }
  0x9a   : > { %1454 = vmatpush.bf16.msra.mxu2 %v1423_v8  ;;  %1455 = vmatpush.bf16.msra.mxu3 %v1423_v8 }
  0x9c   : > { %642 = vmatmul.bf16.vlgmr.msra.gmra.mxu0 %v1415_v9  ;;  %652 = vmatmul.bf16.vlgmr.msra.gmra.mxu1 %v1417_v10 }
  0x9d   : > { %662 = vmatmul.bf16.vlgmr.msra.gmra.mxu2 %v1419_v11  ;;  %672 = vmatmul.bf16.vlgmr.msra.gmra.mxu3 %v1421_v12 }
  0xac   : > { %647 = vmatmul.bf16.gmra.mxu0 %v1416_v13  ;;  %657 = vmatmul.bf16.gmra.mxu1 %v1418_v14 }
  0xad   : > { %667 = vmatmul.bf16.gmra.mxu2 %v1420_v15  ;;  %677 = vmatmul.bf16.gmra.mxu3 %v1422_v16 }
 0x119   : > { %v643_v19 = vpop.f32.mrf.mxu0  ;;  %v653_v20 = vpop.f32.mrf.mxu1 }
 0x11a   : > { %v683_v21 = vadd.f32 %v643_v19, %v490_v17  ;;  %v687_v22 = vadd.f32 %v653_v20, %v494_v18 }
 0x11c   : > { %700 = vst.msk [vmem:[#allocation2] sm:$0xff] %vm699_vm1, %v683_v21 }
 0x11d   : > { %704 = vst.msk [vmem:[#allocation2 + $0x20] sm:$0xff] %vm699_vm1, %v687_v22 }
 0x120   : > { %v663_v27 = vpop.f32.mrf.mxu2  ;;  %v673_v28 = vpop.f32.mrf.mxu3 }
 0x121   : > { %v691_v29 = vadd.f32 %v663_v27, %v498_v23  ;;  %v695_v30 = vadd.f32 %v673_v28, %v502_v24  ;;  %v645_v31 = vpop.f32.mrf.mxu0  ;;  %v655_v32 = vpop.f32.mrf.mxu1 }
 0x122   : > { %v684_v33 = vadd.f32 %v645_v31, %v491_v25  ;;  %v688_v34 = vadd.f32 %v655_v32, %v495_v26 }
 0x123   : > { %708 = vst.msk [vmem:[#allocation2 + $0x40] sm:$0xff] %vm699_vm1, %v691_v29 }
 0x124   : > { %712 = vst.msk [vmem:[#allocation2 + $0x60] sm:$0xff] %vm699_vm1, %v695_v30 }
 0x125   : > { %701 = vst.msk [vmem:[#allocation2 + $0x8] sm:$0xff] %vm699_vm1, %v684_v33 }
 0x126   : > { %705 = vst.msk [vmem:[#allocation2 + $0x28] sm:$0xff] %vm699_vm1, %v688_v34 }
 0x128   : > { %v665_v39 = vpop.f32.mrf.mxu2  ;;  %v675_v40 = vpop.f32.mrf.mxu3 }
 0x129   : > { %v692_v41 = vadd.f32 %v665_v39, %v499_v35  ;;  %v696_v42 = vadd.f32 %v675_v40, %v503_v36  ;;  %v648_v43 = vpop.f32.mrf.mxu0  ;;  %v658_v44 = vpop.f32.mrf.mxu1 }
 0x12a   : > { %v685_v45 = vadd.f32 %v648_v43, %v492_v37  ;;  %v689_v46 = vadd.f32 %v658_v44, %v496_v38 }
 0x12b   : > { %709 = vst.msk [vmem:[#allocation2 + $0x48] sm:$0xff] %vm699_vm1, %v692_v41 }
 0x12c   : > { %713 = vst.msk [vmem:[#allocation2 + $0x68] sm:$0xff] %vm699_vm1, %v696_v42 }
 0x12d   : > { %702 = vst.msk [vmem:[#allocation2 + $0x10] sm:$0xff] %vm699_vm1, %v685_v45 }
 0x12e   : > { %706 = vst.msk [vmem:[#allocation2 + $0x30] sm:$0xff] %vm699_vm1, %v689_v46 }
 0x130   : > { %v668_v51 = vpop.f32.mrf.mxu2  ;;  %v678_v52 = vpop.f32.mrf.mxu3 }
 0x131   : > { %v693_v53 = vadd.f32 %v668_v51, %v500_v47  ;;  %v697_v54 = vadd.f32 %v678_v52, %v504_v48  ;;  %v650_v55 = vpop.f32.mrf.mxu0  ;;  %v660_v56 = vpop.f32.mrf.mxu1 }
 0x132   : > { %v686_v57 = vadd.f32 %v650_v55, %v493_v49  ;;  %v690_v58 = vadd.f32 %v660_v56, %v497_v50 }
 0x133   : > { %710 = vst.msk [vmem:[#allocation2 + $0x50] sm:$0xff] %vm699_vm1, %v693_v53 }
 0x134   : > { %714 = vst.msk [vmem:[#allocation2 + $0x70] sm:$0xff] %vm699_vm1, %v697_v54 }
 0x135   : > { %703 = vst.msk [vmem:[#allocation2 + $0x18] sm:$0xff] %vm699_vm1, %v686_v57 }
 0x136   : > { %707 = vst.msk [vmem:[#allocation2 + $0x38] sm:$0xff] %vm699_vm1, %v690_v58 }
 0x138   : > { %v670_v61 = vpop.f32.mrf.mxu2  ;;  %v680_v62 = vpop.f32.mrf.mxu3 }
 0x139   : > { %v694_v63 = vadd.f32 %v670_v61, %v501_v59  ;;  %v698_v0 = vadd.f32 %v680_v62, %v505_v60 }
 0x13b   : > { %711 = vst.msk [vmem:[#allocation2 + $0x58] sm:$0xff] %vm699_vm1, %v694_v63 }
 0x13c   : > { %715 = vst.msk [vmem:[#allocation2 + $0x78] sm:$0xff] %vm699_vm1, %v698_v0 }
 0x13d PF: > { %p1376_p7 = scmp.ne.s32.totalorder %s1750_s21, 2 }
 0x13f   : > { %719 = sbr.rel (%p1376_p7) target bundleno = 537 (0x219), region = 64 }
 0x144   : > { %v775_v1 = vld [vmem:[%s2267_s5 + $0x38] sm:$0xff]  ;;  %v774_v3 = vld [vmem:[%s2267_s5 + $0x30] sm:$0xff]  ;;  %v773_v5 = vld [vmem:[%s2267_s5 + $0x28] sm:$0xff]  ;;  %vm780_vm2 = vcmask 523264  }
 0x145   : > { %v917_v2 = vld [vmem:[%s2269_s7 + $0x38] sm:$0xff]  ;;  %1456 = vmatpush.msra.mxu2 %v775_v1  ;;  %v916_v4 = vld [vmem:[%s2269_s7 + $0x30] sm:$0xff]  ;;  %837 = vmatpush.msra.mxu0 %v775_v1  ;;  %v915_v6 = vld [vmem:[%s2269_s7 + $0x28] sm:$0xff] }
 0x146   : > { %1464 = vmatpush.msra.mxu3 %v917_v2  ;;  %978 = vmatpush.msra.mxu1 %v917_v2  ;;  %v772_v7 = vld [vmem:[%s2267_s5 + $0x20] sm:$0xff]  ;;  %v771_v9 = vld [vmem:[%s2267_s5 + $0x18] sm:$0xff]  ;;  %v770_v11 = vld [vmem:[%s2267_s5 + $0x10] sm:$0xff] }
 0x147   : > { %1457 = vmatpush.msra.mxu2 %v774_v3  ;;  %838 = vmatpush.msra.mxu0 %v774_v3  ;;  %v914_v8 = vld [vmem:[%s2269_s7 + $0x20] sm:$0xff]  ;;  %v913_v10 = vld [vmem:[%s2269_s7 + $0x18] sm:$0xff]  ;;  %v912_v12 = vld [vmem:[%s2269_s7 + $0x10] sm:$0xff] }
 0x148   : > { %1465 = vmatpush.msra.mxu3 %v916_v4  ;;  %979 = vmatpush.msra.mxu1 %v916_v4  ;;  %v728_v13 = vld [vmem:[%s1994_s12 + $0x40] sm:$0xff]  ;;  %v769_v15 = vld [vmem:[%s2267_s5 + $0x8] sm:$0xff]  ;;  %v730_v33 = vld [vmem:[%s1994_s12 + $0x50] sm:$0xff] }
 0x149   : > { %1458 = vmatpush.msra.mxu2 %v773_v5  ;;  %839 = vmatpush.msra.mxu0 %v773_v5  ;;  %v744_v14 = vld [vmem:[#allocation2 + $0x40] sm:$0xff]  ;;  %v911_v16 = vld [vmem:[%s2269_s7 + $0x8] sm:$0xff]  ;;  %v746_v34 = vld [vmem:[#allocation2 + $0x50] sm:$0xff] }
 0x14a   : > { %1466 = vmatpush.msra.mxu3 %v915_v6  ;;  %980 = vmatpush.msra.mxu1 %v915_v6  ;;  %v720_v17 = vld [vmem:[%s1994_s12] sm:$0xff]  ;;  %v760_v21 = vadd.f32 %v744_v14, %v728_v13  ;;  %v902_v22 = vmul.f32 %v744_v14, %v728_v13  ;;  %v729_v25 = vld [vmem:[%s1994_s12 + $0x48] sm:$0xff]  ;;  %v722_v35 = vld [vmem:[%s1994_s12 + $0x10] sm:$0xff]  ;;  %v762_v37 = vadd.f32 %v746_v34, %v730_v33 }
 0x14b   : > { %1459 = vmatpush.msra.mxu2 %v772_v7  ;;  %840 = vmatpush.msra.mxu0 %v772_v7  ;;  %v736_v18 = vld [vmem:[#allocation2] sm:$0xff]  ;;  %v745_v26 = vld [vmem:[#allocation2 + $0x48] sm:$0xff]  ;;  %v738_v36 = vld [vmem:[#allocation2 + $0x10] sm:$0xff]  ;;  %v904_v38 = vmul.f32 %v746_v34, %v730_v33 }
 0x14c   : > { %1467 = vmatpush.msra.mxu3 %v914_v8  ;;  %981 = vmatpush.msra.mxu1 %v914_v8  ;;  %v768_v19 = vld [vmem:[%s2267_s5] sm:$0xff]  ;;  %v752_v23 = vadd.f32 %v736_v18, %v720_v17  ;;  %v894_v24 = vmul.f32 %v736_v18, %v720_v17  ;;  %v721_v27 = vld [vmem:[%s1994_s12 + $0x8] sm:$0xff]  ;;  %v761_v29 = vadd.f32 %v745_v26, %v729_v25  ;;  %v731_v41 = vld [vmem:[%s1994_s12 + $0x58] sm:$0xff] }
 0x14d   : > { %1460 = vmatpush.msra.mxu2 %v771_v9  ;;  %841 = vmatpush.msra.mxu0 %v771_v9  ;;  %v910_v20 = vld [vmem:[%s2269_s7] sm:$0xff]  ;;  %v737_v28 = vld [vmem:[#allocation2 + $0x8] sm:$0xff]  ;;  %v903_v30 = vmul.f32 %v745_v26, %v729_v25  ;;  %v754_v39 = vadd.f32 %v738_v36, %v722_v35  ;;  %v896_v40 = vmul.f32 %v738_v36, %v722_v35  ;;  %v747_v42 = vld [vmem:[#allocation2 + $0x58] sm:$0xff] }
 0x14e   : > { %1468 = vmatpush.msra.mxu3 %v913_v10  ;;  %982 = vmatpush.msra.mxu1 %v913_v10  ;;  %v753_v31 = vadd.f32 %v737_v28, %v721_v27  ;;  %v895_v32 = vmul.f32 %v737_v28, %v721_v27  ;;  %v723_v43 = vld [vmem:[%s1994_s12 + $0x18] sm:$0xff]  ;;  %v763_v45 = vadd.f32 %v747_v42, %v731_v41  ;;  %v732_v49 = vld [vmem:[%s1994_s12 + $0x60] sm:$0xff]  ;;  %v733_v57 = vld [vmem:[%s1994_s12 + $0x68] sm:$0xff] }
 0x14f   : > { %1461 = vmatpush.msra.mxu2 %v770_v11  ;;  %842 = vmatpush.msra.mxu0 %v770_v11  ;;  %v739_v44 = vld [vmem:[#allocation2 + $0x18] sm:$0xff]  ;;  %v905_v46 = vmul.f32 %v747_v42, %v731_v41  ;;  %v748_v50 = vld [vmem:[#allocation2 + $0x60] sm:$0xff]  ;;  %v749_v58 = vld [vmem:[#allocation2 + $0x68] sm:$0xff] }
 0x150   : > { %1469 = vmatpush.msra.mxu3 %v912_v12  ;;  %983 = vmatpush.msra.mxu1 %v912_v12  ;;  %v755_v47 = vadd.f32 %v739_v44, %v723_v43  ;;  %v897_v48 = vmul.f32 %v739_v44, %v723_v43  ;;  %v724_v51 = vld [vmem:[%s1994_s12 + $0x20] sm:$0xff]  ;;  %v764_v53 = vadd.f32 %v748_v50, %v732_v49  ;;  %v725_v59 = vld [vmem:[%s1994_s12 + $0x28] sm:$0xff]  ;;  %v734_v1 = vld [vmem:[%s1994_s12 + $0x70] sm:$0xff] }
 0x151   : > { %1462 = vmatpush.msra.mxu2 %v769_v15  ;;  %843 = vmatpush.msra.mxu0 %v769_v15  ;;  %v740_v52 = vld [vmem:[#allocation2 + $0x20] sm:$0xff]  ;;  %v906_v54 = vmul.f32 %v748_v50, %v732_v49  ;;  %v741_v60 = vld [vmem:[#allocation2 + $0x28] sm:$0xff]  ;;  %v765_v61 = vadd.f32 %v749_v58, %v733_v57  ;;  %v907_v62 = vmul.f32 %v749_v58, %v733_v57  ;;  %v750_v2 = vld [vmem:[#allocation2 + $0x70] sm:$0xff] }
 0x152   : > { %1470 = vmatpush.msra.mxu3 %v911_v16  ;;  %984 = vmatpush.msra.mxu1 %v911_v16  ;;  %v756_v55 = vadd.f32 %v740_v52, %v724_v51  ;;  %v898_v56 = vmul.f32 %v740_v52, %v724_v51  ;;  %v757_v63 = vadd.f32 %v741_v60, %v725_v59  ;;  %v726_v3 = vld [vmem:[%s1994_s12 + $0x30] sm:$0xff]  ;;  %v735_v9 = vld [vmem:[%s1994_s12 + $0x78] sm:$0xff]  ;;  %v2154_v17 = vld [vmem:[%s2268_s6] ss:$0 sm:$0xff] }
 0x153   : > { %1463 = vmatpush.msra.mxu2 %v768_v19  ;;  %844 = vmatpush.msra.mxu0 %v768_v19  ;;  %v899_v0 = vmul.f32 %v741_v60, %v725_v59  ;;  %v742_v4 = vld [vmem:[#allocation2 + $0x30] sm:$0xff]  ;;  %v766_v5 = vadd.f32 %v750_v2, %v734_v1  ;;  %v908_v6 = vmul.f32 %v750_v2, %v734_v1  ;;  %v751_v10 = vld [vmem:[#allocation2 + $0x78] sm:$0xff]  ;;  %v2159_v18 = vld [vmem:[%s2270_s8] ss:$0 sm:$0xff] }
 0x154   : > { %1471 = vmatpush.msra.mxu3 %v910_v20  ;;  %1385 = vmatmul.msk.f32.vlgmr.msra.gmra.mxu2 %vm780_vm2, %v760_v21  ;;  %v758_v7 = vadd.f32 %v742_v4, %v726_v3  ;;  %v900_v8 = vmul.f32 %v742_v4, %v726_v3  ;;  %v727_v11 = vld [vmem:[%s1994_s12 + $0x38] sm:$0xff]  ;;  %v767_v13 = vadd.f32 %v751_v10, %v735_v9 }
 0x155   : > { %1401 = vmatmul.msk.f32.vlgmr.msra.gmra.mxu3 %vm780_vm2, %v902_v22  ;;  %985 = vmatpush.msra.mxu1 %v910_v20  ;;  %v743_v12 = vld [vmem:[#allocation2 + $0x38] sm:$0xff]  ;;  %v909_v14 = vmul.f32 %v751_v10, %v735_v9 }
 0x156   : > { %1377 = vmatmul.msk.f32.vlgmr.msra.gmra.mxu0 %vm780_vm2, %v752_v23  ;;  %1393 = vmatmul.msk.f32.vlgmr.msra.gmra.mxu1 %vm780_vm2, %v894_v24  ;;  %v759_v15 = vadd.f32 %v743_v12, %v727_v11  ;;  %v901_v16 = vmul.f32 %v743_v12, %v727_v11 }
 0x15c   : > { %1386 = vmatmul.msk.f32.gmra.mxu2 %vm780_vm2, %v761_v29 }
 0x15d   : > { %1402 = vmatmul.msk.f32.gmra.mxu3 %vm780_vm2, %v903_v30 }
 0x15e   : > { %1378 = vmatmul.msk.f32.gmra.mxu0 %vm780_vm2, %v753_v31  ;;  %1394 = vmatmul.msk.f32.gmra.mxu1 %vm780_vm2, %v895_v32 }
 0x164   : > { %1387 = vmatmul.msk.f32.gmra.mxu2 %vm780_vm2, %v762_v37 }
 0x165   : > { %1403 = vmatmul.msk.f32.gmra.mxu3 %vm780_vm2, %v904_v38 }
 0x166   : > { %1379 = vmatmul.msk.f32.gmra.mxu0 %vm780_vm2, %v754_v39  ;;  %1395 = vmatmul.msk.f32.gmra.mxu1 %vm780_vm2, %v896_v40 }
 0x16c   : > { %1388 = vmatmul.msk.f32.gmra.mxu2 %vm780_vm2, %v763_v45 }
 0x16d   : > { %1404 = vmatmul.msk.f32.gmra.mxu3 %vm780_vm2, %v905_v46 }
 0x16e   : > { %1380 = vmatmul.msk.f32.gmra.mxu0 %vm780_vm2, %v755_v47  ;;  %1396 = vmatmul.msk.f32.gmra.mxu1 %vm780_vm2, %v897_v48 }
 0x174   : > { %1389 = vmatmul.msk.f32.gmra.mxu2 %vm780_vm2, %v764_v53 }
 0x175   : > { %1405 = vmatmul.msk.f32.gmra.mxu3 %vm780_vm2, %v906_v54 }
 0x176   : > { %1381 = vmatmul.msk.f32.gmra.mxu0 %vm780_vm2, %v756_v55  ;;  %1397 = vmatmul.msk.f32.gmra.mxu1 %vm780_vm2, %v898_v56 }
 0x17c   : > { %1390 = vmatmul.msk.f32.gmra.mxu2 %vm780_vm2, %v765_v61 }
 0x17d   : > { %1406 = vmatmul.msk.f32.gmra.mxu3 %vm780_vm2, %v907_v62 }
 0x17e   : > { %1382 = vmatmul.msk.f32.gmra.mxu0 %vm780_vm2, %v757_v63  ;;  %1398 = vmatmul.msk.f32.gmra.mxu1 %vm780_vm2, %v899_v0 }
 0x184   : > { %1391 = vmatmul.msk.f32.gmra.mxu2 %vm780_vm2, %v766_v5 }
 0x185   : > { %1407 = vmatmul.msk.f32.gmra.mxu3 %vm780_vm2, %v908_v6 }
 0x186   : > { %1383 = vmatmul.msk.f32.gmra.mxu0 %vm780_vm2, %v758_v7  ;;  %1399 = vmatmul.msk.f32.gmra.mxu1 %vm780_vm2, %v900_v8 }
 0x18c   : > { %1392 = vmatmul.msk.f32.gmra.mxu2 %vm780_vm2, %v767_v13 }
 0x18d   : > { %1408 = vmatmul.msk.f32.gmra.mxu3 %vm780_vm2, %v909_v14 }
 0x18e   : > { %1384 = vmatmul.msk.f32.gmra.mxu0 %vm780_vm2, %v759_v15  ;;  %1400 = vmatmul.msk.f32.gmra.mxu1 %vm780_vm2, %v901_v16 }
 0x1d3   : > { %v846_v19 = vpop.f32.mrf.mxu0  ;;  %v987_v20 = vpop.f32.mrf.mxu1 }
 0x1d4   : > { %v847_v21 = vadd.f32 %v2154_v17, %v846_v19  ;;  %v988_v22 = vadd.f32 %v2159_v18, %v987_v20 }
 0x1d6   : > { %vm1035_vm3 = vcmp.ge.f32.partialorder %v847_v21, 0.0  ;;  %v1051_v23 = vmul.f32 0.01, %v847_v21  ;;  %vm1083_vm4 = vcmp.ge.f32.partialorder %v988_v22, 0.0  ;;  %v1099_v24 = vmul.f32 0.01, %v988_v22 }
 0x1d7   : > { %v870_v25 = vpop.f32.mrf.mxu2 }
 0x1d8   : > { %v1011_v26 = vpop.f32.mrf.mxu3  ;;  %v1067_v27 = vsel %vm1035_vm3, %v847_v21, %v1051_v23  ;;  %v1115_v28 = vsel %vm1083_vm4, %v988_v22, %v1099_v24  ;;  %v871_v29 = vadd.f32 %v2154_v17, %v870_v25 }
 0x1d9   : > { %v1012_v30 = vadd.f32 %v2159_v18, %v1011_v26  ;;  %v1131_v31 = vadd.f32 %v1115_v28, %v1067_v27 }
 0x1da   : > { %vm1043_vm5 = vcmp.ge.f32.partialorder %v871_v29, 0.0  ;;  %v1059_v32 = vmul.f32 0.01, %v871_v29 }
 0x1db   : > { %vm1091_vm6 = vcmp.ge.f32.partialorder %v1012_v30, 0.0  ;;  %v1107_v33 = vmul.f32 0.01, %v1012_v30  ;;  %1147 = vst [vmem:[%s2001_s9] sm:$0xff] %v1131_v31  ;;  %v849_v34 = vpop.f32.mrf.mxu0  ;;  %v990_v35 = vpop.f32.mrf.mxu1 }
 0x1dc   : > { %v1075_v36 = vsel %vm1043_vm5, %v871_v29, %v1059_v32  ;;  %v850_v38 = vadd.f32 %v2154_v17, %v849_v34  ;;  %v991_v39 = vadd.f32 %v2159_v18, %v990_v35 }
 0x1dd   : > { %v1123_v37 = vsel %vm1091_vm6, %v1012_v30, %v1107_v33 }
 0x1de   : > { %v1139_v40 = vadd.f32 %v1123_v37, %v1075_v36  ;;  %vm1036_vm7 = vcmp.ge.f32.partialorder %v850_v38, 0.0  ;;  %v1052_v41 = vmul.f32 0.01, %v850_v38  ;;  %vm1084_vm8 = vcmp.ge.f32.partialorder %v991_v39, 0.0 }
 0x1df   : > { %v1100_v42 = vmul.f32 0.01, %v991_v39  ;;  %v873_v43 = vpop.f32.mrf.mxu2 }
 0x1e0   : > { %1155 = vst [vmem:[%s2001_s9 + $0x40] sm:$0xff] %v1139_v40  ;;  %v1014_v44 = vpop.f32.mrf.mxu3  ;;  %v1068_v45 = vsel %vm1036_vm7, %v850_v38, %v1052_v41  ;;  %v874_v47 = vadd.f32 %v2154_v17, %v873_v43 }
 0x1e1   : > { %v1116_v46 = vsel %vm1084_vm8, %v991_v39, %v1100_v42  ;;  %v1015_v48 = vadd.f32 %v2159_v18, %v1014_v44 }
 0x1e2   : > { %v1132_v49 = vadd.f32 %v1116_v46, %v1068_v45  ;;  %vm1044_vm9 = vcmp.ge.f32.partialorder %v874_v47, 0.0  ;;  %v1060_v50 = vmul.f32 0.01, %v874_v47 }
 0x1e3   : > { %vm1092_vm10 = vcmp.ge.f32.partialorder %v1015_v48, 0.0  ;;  %v1108_v51 = vmul.f32 0.01, %v1015_v48  ;;  %v852_v52 = vpop.f32.mrf.mxu0  ;;  %v993_v53 = vpop.f32.mrf.mxu1 }
 0x1e4   : > { %1148 = vst [vmem:[%s2001_s9 + $0x8] sm:$0xff] %v1132_v49  ;;  %v1076_v54 = vsel %vm1044_vm9, %v874_v47, %v1060_v50  ;;  %v853_v56 = vadd.f32 %v2154_v17, %v852_v52  ;;  %v994_v57 = vadd.f32 %v2159_v18, %v993_v53 }
 0x1e5   : > { %v1124_v55 = vsel %vm1092_vm10, %v1015_v48, %v1108_v51 }
 0x1e6   : > { %v1140_v58 = vadd.f32 %v1124_v55, %v1076_v54  ;;  %vm1037_vm11 = vcmp.ge.f32.partialorder %v853_v56, 0.0  ;;  %v1053_v59 = vmul.f32 0.01, %v853_v56  ;;  %vm1085_vm12 = vcmp.ge.f32.partialorder %v994_v57, 0.0 }
 0x1e7   : > { %v1101_v60 = vmul.f32 0.01, %v994_v57  ;;  %v876_v61 = vpop.f32.mrf.mxu2 }
 0x1e8   : > { %1156 = vst [vmem:[%s2001_s9 + $0x48] sm:$0xff] %v1140_v58  ;;  %v1017_v62 = vpop.f32.mrf.mxu3  ;;  %v1069_v63 = vsel %vm1037_vm11, %v853_v56, %v1053_v59  ;;  %v877_v1 = vadd.f32 %v2154_v17, %v876_v61 }
 0x1e9   : > { %v1117_v0 = vsel %vm1085_vm12, %v994_v57, %v1101_v60  ;;  %v1018_v2 = vadd.f32 %v2159_v18, %v1017_v62 }
 0x1ea   : > { %v1133_v3 = vadd.f32 %v1117_v0, %v1069_v63  ;;  %vm1045_vm13 = vcmp.ge.f32.partialorder %v877_v1, 0.0  ;;  %v1061_v4 = vmul.f32 0.01, %v877_v1 }
 0x1eb   : > { %vm1093_vm14 = vcmp.ge.f32.partialorder %v1018_v2, 0.0  ;;  %v1109_v5 = vmul.f32 0.01, %v1018_v2  ;;  %v855_v6 = vpop.f32.mrf.mxu0  ;;  %v996_v7 = vpop.f32.mrf.mxu1 }
 0x1ec   : > { %1149 = vst [vmem:[%s2001_s9 + $0x10] sm:$0xff] %v1133_v3  ;;  %v1077_v8 = vsel %vm1045_vm13, %v877_v1, %v1061_v4  ;;  %v856_v10 = vadd.f32 %v2154_v17, %v855_v6  ;;  %v997_v11 = vadd.f32 %v2159_v18, %v996_v7 }
 0x1ed   : > { %v1125_v9 = vsel %vm1093_vm14, %v1018_v2, %v1109_v5 }
 0x1ee   : > { %v1141_v12 = vadd.f32 %v1125_v9, %v1077_v8  ;;  %vm1038_vm15 = vcmp.ge.f32.partialorder %v856_v10, 0.0  ;;  %v1054_v13 = vmul.f32 0.01, %v856_v10  ;;  %vm1086_vm0 = vcmp.ge.f32.partialorder %v997_v11, 0.0 }
 0x1ef   : > { %v1102_v14 = vmul.f32 0.01, %v997_v11  ;;  %v879_v15 = vpop.f32.mrf.mxu2 }
 0x1f0   : > { %1157 = vst [vmem:[%s2001_s9 + $0x50] sm:$0xff] %v1141_v12  ;;  %v1020_v16 = vpop.f32.mrf.mxu3  ;;  %v1070_v19 = vsel %vm1038_vm15, %v856_v10, %v1054_v13  ;;  %v880_v21 = vadd.f32 %v2154_v17, %v879_v15 }
 0x1f1   : > { %v1118_v20 = vsel %vm1086_vm0, %v997_v11, %v1102_v14  ;;  %v1021_v22 = vadd.f32 %v2159_v18, %v1020_v16 }
 0x1f2   : > { %v1134_v23 = vadd.f32 %v1118_v20, %v1070_v19  ;;  %vm1046_vm1 = vcmp.ge.f32.partialorder %v880_v21, 0.0  ;;  %v1062_v24 = vmul.f32 0.01, %v880_v21 }
 0x1f3   : > { %vm1094_vm2 = vcmp.ge.f32.partialorder %v1021_v22, 0.0  ;;  %v1110_v25 = vmul.f32 0.01, %v1021_v22  ;;  %v858_v26 = vpop.f32.mrf.mxu0  ;;  %v999_v27 = vpop.f32.mrf.mxu1 }
 0x1f4   : > { %1150 = vst [vmem:[%s2001_s9 + $0x18] sm:$0xff] %v1134_v23  ;;  %v1078_v28 = vsel %vm1046_vm1, %v880_v21, %v1062_v24  ;;  %v859_v30 = vadd.f32 %v2154_v17, %v858_v26  ;;  %v1000_v31 = vadd.f32 %v2159_v18, %v999_v27 }
 0x1f5   : > { %v1126_v29 = vsel %vm1094_vm2, %v1021_v22, %v1110_v25 }
 0x1f6   : > { %v1142_v32 = vadd.f32 %v1126_v29, %v1078_v28  ;;  %vm1039_vm3 = vcmp.ge.f32.partialorder %v859_v30, 0.0  ;;  %v1055_v33 = vmul.f32 0.01, %v859_v30  ;;  %vm1087_vm4 = vcmp.ge.f32.partialorder %v1000_v31, 0.0 }
 0x1f7   : > { %v1103_v34 = vmul.f32 0.01, %v1000_v31  ;;  %v882_v35 = vpop.f32.mrf.mxu2 }
 0x1f8   : > { %1158 = vst [vmem:[%s2001_s9 + $0x58] sm:$0xff] %v1142_v32  ;;  %v1023_v36 = vpop.f32.mrf.mxu3  ;;  %v1071_v37 = vsel %vm1039_vm3, %v859_v30, %v1055_v33  ;;  %v883_v39 = vadd.f32 %v2154_v17, %v882_v35 }
 0x1f9   : > { %v1119_v38 = vsel %vm1087_vm4, %v1000_v31, %v1103_v34  ;;  %v1024_v40 = vadd.f32 %v2159_v18, %v1023_v36 }
 0x1fa   : > { %v1135_v41 = vadd.f32 %v1119_v38, %v1071_v37  ;;  %vm1047_vm5 = vcmp.ge.f32.partialorder %v883_v39, 0.0  ;;  %v1063_v42 = vmul.f32 0.01, %v883_v39 }
 0x1fb   : > { %vm1095_vm6 = vcmp.ge.f32.partialorder %v1024_v40, 0.0  ;;  %v1111_v43 = vmul.f32 0.01, %v1024_v40  ;;  %v861_v44 = vpop.f32.mrf.mxu0  ;;  %v1002_v45 = vpop.f32.mrf.mxu1 }
 0x1fc   : > { %1151 = vst [vmem:[%s2001_s9 + $0x20] sm:$0xff] %v1135_v41  ;;  %v1079_v46 = vsel %vm1047_vm5, %v883_v39, %v1063_v42  ;;  %v862_v48 = vadd.f32 %v2154_v17, %v861_v44  ;;  %v1003_v49 = vadd.f32 %v2159_v18, %v1002_v45 }
 0x1fd   : > { %v1127_v47 = vsel %vm1095_vm6, %v1024_v40, %v1111_v43 }
 0x1fe   : > { %v1143_v50 = vadd.f32 %v1127_v47, %v1079_v46  ;;  %vm1040_vm7 = vcmp.ge.f32.partialorder %v862_v48, 0.0  ;;  %v1056_v51 = vmul.f32 0.01, %v862_v48  ;;  %vm1088_vm8 = vcmp.ge.f32.partialorder %v1003_v49, 0.0 }
 0x1ff   : > { %v1104_v52 = vmul.f32 0.01, %v1003_v49  ;;  %v885_v53 = vpop.f32.mrf.mxu2 }
 0x200   : > { %1159 = vst [vmem:[%s2001_s9 + $0x60] sm:$0xff] %v1143_v50  ;;  %v1026_v54 = vpop.f32.mrf.mxu3  ;;  %v1072_v55 = vsel %vm1040_vm7, %v862_v48, %v1056_v51  ;;  %v886_v57 = vadd.f32 %v2154_v17, %v885_v53 }
 0x201   : > { %v1120_v56 = vsel %vm1088_vm8, %v1003_v49, %v1104_v52  ;;  %v1027_v58 = vadd.f32 %v2159_v18, %v1026_v54 }
 0x202   : > { %v1136_v59 = vadd.f32 %v1120_v56, %v1072_v55  ;;  %vm1048_vm9 = vcmp.ge.f32.partialorder %v886_v57, 0.0  ;;  %v1064_v60 = vmul.f32 0.01, %v886_v57 }
 0x203   : > { %vm1096_vm10 = vcmp.ge.f32.partialorder %v1027_v58, 0.0  ;;  %v1112_v61 = vmul.f32 0.01, %v1027_v58  ;;  %v864_v62 = vpop.f32.mrf.mxu0  ;;  %v1005_v63 = vpop.f32.mrf.mxu1 }
 0x204   : > { %1152 = vst [vmem:[%s2001_s9 + $0x28] sm:$0xff] %v1136_v59  ;;  %v1080_v0 = vsel %vm1048_vm9, %v886_v57, %v1064_v60  ;;  %v865_v2 = vadd.f32 %v2154_v17, %v864_v62  ;;  %v1006_v3 = vadd.f32 %v2159_v18, %v1005_v63 }
 0x205   : > { %v1128_v1 = vsel %vm1096_vm10, %v1027_v58, %v1112_v61 }
 0x206   : > { %v1144_v4 = vadd.f32 %v1128_v1, %v1080_v0  ;;  %vm1041_vm11 = vcmp.ge.f32.partialorder %v865_v2, 0.0  ;;  %v1057_v5 = vmul.f32 0.01, %v865_v2  ;;  %vm1089_vm12 = vcmp.ge.f32.partialorder %v1006_v3, 0.0 }
 0x207   : > { %v1105_v6 = vmul.f32 0.01, %v1006_v3  ;;  %v888_v7 = vpop.f32.mrf.mxu2 }
 0x208   : > { %1160 = vst [vmem:[%s2001_s9 + $0x68] sm:$0xff] %v1144_v4  ;;  %v1029_v8 = vpop.f32.mrf.mxu3  ;;  %v1073_v9 = vsel %vm1041_vm11, %v865_v2, %v1057_v5  ;;  %v889_v11 = vadd.f32 %v2154_v17, %v888_v7 }
 0x209   : > { %v1121_v10 = vsel %vm1089_vm12, %v1006_v3, %v1105_v6  ;;  %v1030_v12 = vadd.f32 %v2159_v18, %v1029_v8 }
 0x20a   : > { %v1137_v13 = vadd.f32 %v1121_v10, %v1073_v9  ;;  %vm1049_vm13 = vcmp.ge.f32.partialorder %v889_v11, 0.0  ;;  %v1065_v14 = vmul.f32 0.01, %v889_v11 }
 0x20b   : > { %vm1097_vm14 = vcmp.ge.f32.partialorder %v1030_v12, 0.0  ;;  %v1113_v15 = vmul.f32 0.01, %v1030_v12  ;;  %v867_v16 = vpop.f32.mrf.mxu0  ;;  %v1008_v19 = vpop.f32.mrf.mxu1 }
 0x20c   : > { %1153 = vst [vmem:[%s2001_s9 + $0x30] sm:$0xff] %v1137_v13  ;;  %v1081_v20 = vsel %vm1049_vm13, %v889_v11, %v1065_v14  ;;  %v868_v22 = vadd.f32 %v2154_v17, %v867_v16  ;;  %v1009_v23 = vadd.f32 %v2159_v18, %v1008_v19 }
 0x20d   : > { %v1129_v21 = vsel %vm1097_vm14, %v1030_v12, %v1113_v15 }
 0x20e   : > { %v1145_v24 = vadd.f32 %v1129_v21, %v1081_v20  ;;  %vm1042_vm15 = vcmp.ge.f32.partialorder %v868_v22, 0.0  ;;  %v1058_v25 = vmul.f32 0.01, %v868_v22  ;;  %vm1090_vm0 = vcmp.ge.f32.partialorder %v1009_v23, 0.0 }
 0x20f   : > { %v1106_v26 = vmul.f32 0.01, %v1009_v23  ;;  %v891_v27 = vpop.f32.mrf.mxu2 }
 0x210   : > { %1161 = vst [vmem:[%s2001_s9 + $0x70] sm:$0xff] %v1145_v24  ;;  %v1032_v28 = vpop.f32.mrf.mxu3  ;;  %v1074_v29 = vsel %vm1042_vm15, %v868_v22, %v1058_v25  ;;  %v892_v31 = vadd.f32 %v2154_v17, %v891_v27 }
 0x211   : > { %v1122_v30 = vsel %vm1090_vm0, %v1009_v23, %v1106_v26  ;;  %v1033_v32 = vadd.f32 %v2159_v18, %v1032_v28 }
 0x212   : > { %v1138_v33 = vadd.f32 %v1122_v30, %v1074_v29  ;;  %vm1050_vm1 = vcmp.ge.f32.partialorder %v892_v31, 0.0  ;;  %v1066_v34 = vmul.f32 0.01, %v892_v31 }
 0x213   : > { %vm1098_vm2 = vcmp.ge.f32.partialorder %v1033_v32, 0.0  ;;  %v1114_v35 = vmul.f32 0.01, %v1033_v32 }
 0x214   : > { %1154 = vst [vmem:[%s2001_s9 + $0x38] sm:$0xff] %v1138_v33  ;;  %v1082_v36 = vsel %vm1050_vm1, %v892_v31, %v1066_v34 }
 0x215   : > { %v1130_v37 = vsel %vm1098_vm2, %v1033_v32, %v1114_v35 }
 0x216   : > { %v1146_v38 = vadd.f32 %v1130_v37, %v1082_v36 }
 0x218   : > { %1162 = vst [vmem:[%s2001_s9 + $0x78] sm:$0xff] %v1146_v38 }
 0x219 PF: > { %s1431_s10 = sshll.u32 %s1754_s22, 7  ;;  %s2300_s15 = sld [smem:[#allocation25_spill]] }
 0x21a   : > { %s1176_s21 = sshll.u32 %s2001_s9, 4  ;;  %s1164_s20 = scalar_lea.sflag [#allocation8], %s423_s13  ;;  %s1177_s21 = int_to_ptr.vmem [resolvable:$true] %s1176_s21 }
 0x21f   : > { %s1175_s30 = scalar_lea.hbm %s2300_s15, %s1431_s10  ;;  %s1662_s22 = scalar_lea.hbm %s2300_s15, 512 }
 0x220   : > { %s1178_s18 = sshll.u32 %s1175_s30, 4  ;;  %s1179_s18 = int_to_ptr.hbm [resolvable:$true] %s1178_s18 }
 0x221   : > { %s1656_s17 = sshra.s32 %s1179_s18, 4  ;;  %s1657_s17 = int_to_ptr.hbm [resolvable:$true] %s1656_s17 }
 0x222   : > { %s1658_s24 = scalar_lea.hbm %s1657_s17, 128  ;;  %p1663_p13 = scmp.lt.s32.totalorder %s1657_s17, %s2300_s15 }
 0x223   : > { %p1659_p9 = scmp.ne.s32.totalorder %s1657_s17, %s1658_s24  ;;  %p1664_p1 = scmp.lt.s32.totalorder %s1662_s22, %s1658_s24 }
 0x225   : > { %p1660_p11 = pnand %p1659_p9, %p1927_p10  ;;  %p1665_p3 = por %p1664_p1, %p1663_p13 }
 0x227   : > { %p1661_p12 = pneg %p1660_p11 }
 0x229   : > { %p1666_p2 = pnand %p1665_p3, %p1661_p12 }
 0x22b   : > { %1669 = shalt.err (!%p1666_p2)
}
 0x22c   : > { %s1774_s13 = smov 128   ;;  %s1775_s9 = smov 8  }
 0x22d   : > { %1476 = dma.vmem_to_hbm [thread:$0]  (%p1927_p10), %s1177_s21, 2048, %s1179_s18, %s1164_s20, %s1774_s13, %s1774_s13, %s1775_s9  }
 0x22e PF: > { %s2301_s28 = sld [smem:[#allocation15_spill]]  ;;  %p1489_p5 = scmp.ge.s32.totalorder %s1766_s25, 2 }
 0x230   : > { %p1485_p8 = pnand %p1489_p5, %p1933_p0 }
 0x232   : > { %p1486_p4 = pneg %p1485_p8 }
 0x234   : > { %s1193_s12 = sand.u32 1, %s2301_s28  }
 0x235   : > { %s1194_s10 = scalar_lea.sflag [#allocation8], %s1193_s12 }
 0x236   : > { %1721 = dma.done.wait (%p1486_p4), %s1194_s10, 2048  }
 0x237   : > { %1723 = vsyncadd (%p1486_p4), %s1194_s10, 4294965248  ;;  %s38_s25 = sadd.s32 1, %s1766_s25   ;;  %s2303_s11 = sld [smem:[#allocation16_spill]] }
 0x238   : > { %p35_p6 = scmp.ge.s32.totalorder %s38_s25, 14   ;;  %s2304_s18 = sld [smem:[#allocation22_spill]] }
 0x239   : > { %s2305_s16 = sld [smem:[#allocation17_spill]]  ;;  %s2311_s17 = smov %s1730_s0 }
 0x23a   : > { %s2306_s20 = sld [smem:[#allocation24_spill]]  ;;  %s2313_s1 = smov %s1742_s19 }
 0x23b   : > { %s2307_s21 = sld [smem:[#allocation18_spill]]  ;;  %37 = sbr.rel (!%p35_p6) target bundleno = 17 (0x11), region = 111 }
 0x23c   : > { %s2308_s22 = sld [smem:[#allocation19_spill]] }
 0x23d   : > { %s2309_s23 = sld [smem:[#allocation20_spill]]  ;;  %s2312_s0 = smov %s2303_s11 }
 0x23e   : > { %s2310_s24 = sld [smem:[#allocation21_spill]] }
 0x23f   : > { %s2314_s19 = smov %s2305_s16 }
 0x240   :  { %1200 = vsyncpa [#allocation7], 1 }
 0x241   :  { %1202 = vsyncpa [#allocation7 + $0x1], 1 }
 0x242   :  { %1203 = vsyncpa [#allocation8], 1 }
 0x243   :  { %1205 = vsyncpa [#allocation8 + $0x1], 1 }

</bundles_post_ra>
